<compile_context>
chip_gen: v6e
topology: v6e:2x2x1
jax: 0.10.0
libtpu: 0.0.40
codegen_flags: <defaults>
</compile_context>

<pallas_src>
import functools

import jax
import jax.numpy as jnp
from jax import lax
from jax.experimental import pallas as pl
from jax.experimental.pallas import tpu as pltpu


# ----------------------------------------------------------------------------
# Kernel: partial Gram matrix  G_k = x[:, k*tile:(k+1)*tile] @ x[:, ...]^T
# One (B, B) partial per grid step; no resident accumulator so the grid axis
# can be "parallel" (megacore on v7x).  Tail columns (D not a multiple of the
# tile) are masked to zero before the contraction.
# ----------------------------------------------------------------------------
def _gram_kernel(x_ref, g_ref, *, d_total, tile, mask_tail):
    x = x_ref[...]                                           # (B, tile), input dtype
    if mask_tail:
        k = pl.program_id(0)
        col = lax.broadcasted_iota(jnp.int32, x.shape, 1) + k * tile
        x = jnp.where(col < d_total, x, jnp.zeros((), x.dtype))
    # Contract over the D axis directly (no explicit transpose materialized);
    # MXU accumulates into f32.
    g = lax.dot_general(
        x, x,
        dimension_numbers=(((1,), (1,)), ((), ())),
        preferred_element_type=jnp.float32,
    )                                                        # (B, B) f32
    g_ref[...] = g


def _gram(x, *, max_tile=4096):
    """G = x @ x^T for x of shape (B, D), computed in one streaming pass."""
    B, D = x.shape
    # Largest lane-axis tile that fits comfortably: full D if small, otherwise
    # a big multiple of 128 (per-step VMEM is only 2 * B * tile * bytes).
    if D <= max_tile:
        tile = D
    else:
        tile = max((max_tile // 128) * 128, 128)
    n_chunks = -(-D // tile)
    mask_tail = (D % tile) != 0

    kernel = functools.partial(
        _gram_kernel, d_total=D, tile=tile, mask_tail=mask_tail)

    partials = pl.pallas_call(
        kernel,
        out_shape=jax.ShapeDtypeStruct((n_chunks, B, B), jnp.float32),
        grid_spec=pltpu.PrefetchScalarGridSpec(
            num_scalar_prefetch=0,
            grid=(n_chunks,),
            in_specs=[pl.BlockSpec((B, tile), lambda k: (0, k))],
            out_specs=pl.BlockSpec((None, B, B), lambda k: (k, 0, 0)),
        ),
        compiler_params=pltpu.CompilerParams(
            dimension_semantics=("parallel",)),
    )(x)

    return jnp.sum(partials, axis=0)                         # (B, B)


# ----------------------------------------------------------------------------
# DiffLoss forward.
# ----------------------------------------------------------------------------
def diff_loss(input1, input2, *, max_tile=4096):
    """Pallas implementation of DiffLoss.forward. Inputs: any shape with a
    leading batch dim (flattened row-major like torch .view(B, -1)).
    Returns a float32 scalar."""
    B = input1.shape[0]
    x1 = input1.reshape(B, -1)
    x2 = input2.reshape(B, -1)
    D1 = x1.shape[1]
    D2 = x2.shape[1]

    G1 = _gram(x1, max_tile=max_tile)                        # (B, B) f32
    G2 = _gram(x2, max_tile=max_tile)

    # Row L2 norms are the Gram diagonals.
    n1 = jnp.sqrt(jnp.diagonal(G1)) + 1e-6                   # (B,)
    n2 = jnp.sqrt(jnp.diagonal(G2)) + 1e-6

    G1n = G1 / (n1[:, None] * n1[None, :])
    G2n = G2 / (n2[:, None] * n2[None, :])

    # sum((x1n^T @ x2n)^2) == <G1n, G2n>_F ; mean divides by D1*D2.
    return jnp.sum(G1n * G2n) / jnp.float32(D1 * D2)


# ----------------------------------------------------------------------------
# Pure-JAX reference (mirrors the PyTorch forward 1:1) for verification.
# ----------------------------------------------------------------------------
def diff_loss_ref(input1, input2):
    B = input1.shape[0]
    x1 = input1.reshape(B, -1).astype(jnp.float32)
    x2 = input2.reshape(B, -1).astype(jnp.float32)
    n1 = jnp.linalg.norm(x1, axis=1, keepdims=True)
    n2 = jnp.linalg.norm(x2, axis=1, keepdims=True)
    x1n = x1 / (n1 + 1e-6)
    x2n = x2 / (n2 + 1e-6)
    return jnp.mean((x1n.T @ x2n) ** 2)


if __name__ == "__main__":
    key = jax.random.PRNGKey(0)
    k1, k2, k3, k4 = jax.random.split(key, 4)

    # NCHW inputs like the PyTorch module would receive (e.g. feature maps).
    x1 = jax.random.normal(k1, (2, 4, 16, 16), dtype=jnp.float32)
    x2 = jax.random.normal(k2, (2, 4, 16, 16), dtype=jnp.float32)

    loss = jax.block_until_ready(diff_loss(x1, x2))
    ref = jax.block_until_ready(diff_loss_ref(x1, x2))
    assert jnp.allclose(loss, ref, rtol=1e-5, atol=1e-6), (loss, ref)

    # Ragged-D case (D=300, forced small tile) to exercise the in-kernel tail
    # masking path.
    y1 = jax.random.normal(k3, (2, 3, 10, 10), dtype=jnp.float32)
    y2 = jax.random.normal(k4, (2, 3, 10, 10), dtype=jnp.float32)
    loss2 = jax.block_until_ready(diff_loss(y1, y2, max_tile=128))
    ref2 = jax.block_until_ready(diff_loss_ref(y1, y2))
    assert jnp.allclose(loss2, ref2, rtol=1e-5, atol=1e-6), (loss2, ref2)

    print("KERNEL_OK")
</pallas_src>

<mosaic_0001>
module attributes {stable_mosaic.version = 11 : i64} {
  func.func @_gram_kernel(%arg0: i32, %arg1: memref<2x1024xf32, #tpu.memory_space<vmem>>, %arg2: memref<1x2x2xf32, #tpu.memory_space<vmem>>) attributes {dimension_semantics = [#tpu.dimension_semantics<parallel>], iteration_bounds = array<i64: 1>, scalar_prefetch = 0 : i64, scratch_operands = 0 : i64, tpu.core_type = #tpu.core_type<tc>, window_params = [{transform_indices = @transform_0, window_bounds = array<i64: 2, 1024>}, {transform_indices = @transform_1, window_bounds = array<i64: 1, 2, 2>}]} {
    %c0 = arith.constant 0 : index
    %c0_0 = arith.constant 0 : index
    %0 = vector.load %arg1[%c0, %c0_0] : memref<2x1024xf32, #tpu.memory_space<vmem>>, vector<2x1024xf32>
    %cst = arith.constant dense<0.000000e+00> : vector<2x2xf32>
    %1 = tpu.matmul %0, %0, %cst {dimension_numbers = #tpu.dot_dimension_numbers<[1], [1], [0], [0], [0, 0, 1, 0], [], []>} : vector<2x1024xf32>, vector<2x1024xf32>, vector<2x2xf32> -> vector<2x2xf32>
    %c0_1 = arith.constant 0 : index
    %c0_2 = arith.constant 0 : index
    %c0_3 = arith.constant 0 : index
    %2 = vector.load %arg2[%c0_1, %c0_2, %c0_3] : memref<1x2x2xf32, #tpu.memory_space<vmem>>, vector<1x2x2xf32>
    %3 = vector.shape_cast %2 : vector<1x2x2xf32> to vector<2x2xf32>
    %4 = vector.shape_cast %1 : vector<2x2xf32> to vector<1x2x2xf32>
    tpu.vector_store %arg2[%c0_1, %c0_2, %c0_3], %4 {strides = array<i32>} : memref<1x2x2xf32, #tpu.memory_space<vmem>>, vector<1x2x2xf32>,
    return
  }
  func.func @transform_0(%arg0: i32) -> (i32, i32) {
    %c0_i32 = arith.constant 0 : i32
    %c0_i32_0 = arith.constant 0 : i32
    return %c0_i32, %arg0 : i32, i32
  }
  func.func @transform_1(%arg0: i32) -> (i32, i32, i32) {
    %c0_i32 = arith.constant 0 : i32
    %c0_i32_0 = arith.constant 0 : i32
    %c0_i32_1 = arith.constant 0 : i32
    return %arg0, %c0_i32, %c0_i32_0 : i32, i32, i32
  }
}

</mosaic_0001>

<bundles_post_ra>
// kernel: tpu_custom_call.1
= control target key start
LH: loop header
LB: loop body
LE: loop exit
PB: predicated region body
PF: predicated region fallthrough
CT: control target
= control target key end

     0   :  { %6 = vsyncpa [#allocation3], 0  ;;  %s432_s0 = inlined_call_operand.hbm [shape: f32[2,1024], index: 0, kind: input, shape index: {}]   ;;  %s433_s1 = inlined_call_operand.hbm [shape: f32[1,2,2], index: 1, kind: output, shape index: {}]  }
   0x1   :  { %7 = vsyncpa [#allocation4], 0  ;;  %s413_s6 = smov [#allocation2]  }
   0x2   :  { %s14_s7 = sshll.u32 %s413_s6, 4  ;;  %s15_s7 = int_to_ptr.vmem [resolvable:$true] %s14_s7 }
   0x3   :  { %s377_s8 = scalar_lea.vmem %s15_s7, 256  ;;  %p382_p1 = scmp.lt.s32.totalorder %s15_s7, %s15_s7 }
   0x4   :  { %p378_p0 = scmp.ne.s32.totalorder %s15_s7, %s377_s8  ;;  %p383_p2 = scmp.lt.s32.totalorder %s377_s8, %s377_s8 }
   0x6   :  { %p384_p3 = por %p383_p2, %p382_p1 }
   0x8   :  { %p385_p4 = pnand %p384_p3, %p378_p0 }
   0xa   :  { %388 = shalt.err (!%p385_p4)
}
   0xb   :  { %17 = dma.hbm_to_vmem [thread:$0]  %s432_s0, 256, %s15_s7, [#allocation3]  }
   0xc   :  { %409 = dma.done.wait [#allocation3], 256  }
   0xd   :  { %410 = vsyncadd [#allocation3], 4294967040  ;;  %v29_v0 = vlaneseq  ;;  %v414_v1 = vmov 1983009808   ;;  %v21_v6 = vld [vmem:[#allocation2] sm:$0xff]  ;;  %v22_v7 = vld [vmem:[#allocation2 + $0x8] sm:$0xff] }
   0xe   :  { %v27_v2 = vunpack.c.l.s4 %v414_v1  ;;  %v25_v9 = vcombine.high %v21_v6, %v21_v6  ;;  %v42_v11 = vcombine.high %v22_v7, %v22_v7  ;;  %s415_s0 = smov [#allocation5]   ;;  %vm347_vm0 = vcmask 9216  }
   0xf   :  { %v30_v3 = vshrl.u32 %v29_v0, 7  ;;  %s355_s11 = sshll.u32 %s415_s0, 4  ;;  %s356_s11 = int_to_ptr.vmem [resolvable:$true] %s355_s11 }
  0x10   :  { %v28_v4 = vunpack.c.0.s8 %v27_v2  ;;  %s389_s12 = scalar_lea.vmem %s356_s11, 32  ;;  %p394_p6 = scmp.lt.s32.totalorder %s356_s11, %s356_s11 }
  0x11   :  { %p390_p5 = scmp.ne.s32.totalorder %s356_s11, %s389_s12  ;;  %p395_p7 = scmp.lt.s32.totalorder %s389_s12, %s389_s12 }
  0x12   :  { %v31_v5 = vsub.s32 %v28_v4, %v30_v3 }
  0x13   :  { %p396_p8 = por %p395_p7, %p394_p6 }
  0x14   :  { %v32_v8 = vrot.slane %v21_v6, %v31_v5  ;;  %v49_v10 = vrot.slane %v22_v7, %v31_v5  ;;  %v39_v13 = vrot.slane %v25_v9, %v31_v5  ;;  %v56_v15 = vrot.slane %v42_v11, %v31_v5 }
  0x15   :  { %p397_p9 = pnand %p396_p8, %p390_p5 }
  0x16   :  { %v40_v12 = vcombine.high %v32_v8, %v32_v8  ;;  %v57_v14 = vcombine.high %v49_v10, %v49_v10  ;;  %v41_v16 = vcombine.high %v39_v13, %v39_v13  ;;  %v58_v17 = vcombine.high %v56_v15, %v56_v15 }
  0x18   :  { %97 = vmatprep.subr.mxu0 %v40_v12  ;;  %131 = vmatprep.mubr.f32.mxu0 %v40_v12 }
  0x19   :  { %98 = vmatpush1.xpose.msra.mxu0 %v32_v8  ;;  %167 = vmatprep.subr.mxu1 %v41_v16 }
  0x1a   :  { %237 = vmatprep.subr.mxu0 %v57_v14  ;;  %168 = vmatpush1.xpose.msra.mxu1 %v39_v13 }
  0x1b   :  { %201 = vmatprep.mubr.f32.mxu1 %v41_v16  ;;  %307 = vmatprep.subr.mxu1 %v58_v17 }
  0x1c   :  { %132 = vmatmul.mubr.f32.vlgmr.msra.gmra.mxu0 %v32_v8 }
  0x1d   :  { %238 = vmatpush1.xpose.msra.mxu0 %v49_v10  ;;  %271 = vmatprep.mubr.f32.mxu0 %v57_v14 }
  0x1e   :  { %202 = vmatmul.mubr.f32.vlgmr.msra.gmra.mxu1 %v39_v13 }
  0x1f   :  { %308 = vmatpush1.xpose.msra.mxu1 %v56_v15  ;;  %341 = vmatprep.mubr.f32.mxu1 %v58_v17 }
  0x20   :  { %272 = vmatmul.mubr.f32.vlgmr.msra.gmra.mxu0 %v49_v10 }
  0x22   :  { %342 = vmatmul.mubr.f32.vlgmr.msra.gmra.mxu1 %v56_v15 }
  0xdc   :  { %v133_v18 = vpop.f32.mrf.mxu0 }
  0xde   :  { %v135_v19 = vpop.f32.mrf.mxu0  ;;  %v203_v20 = vpop.f32.mrf.mxu1 }
  0xdf   :  { %v204_v21 = vadd.f32 %v203_v20, %v133_v18 }
  0xe0   :  { %v205_v22 = vpop.f32.mrf.mxu1  ;;  %v273_v23 = vpop.f32.mrf.mxu0 }
  0xe1   :  { %v274_v24 = vadd.f32 %v273_v23, %v204_v21 }
  0xe2   :  { %v275_v25 = vpop.f32.mrf.mxu0  ;;  %v343_v26 = vpop.f32.mrf.mxu1 }
  0xe3   :  { %v344_v27 = vadd.f32 %v343_v26, %v274_v24 }
  0xe4   :  { %v345_v28 = vpop.f32.mrf.mxu1 }
  0xe5   :  { %348 = vst.msk [vmem:[#allocation5] sm:$0x3] %vm347_vm0, %v344_v27 }
  0xe6   :  { %400 = shalt.err (!%p397_p9)
}
  0xe7   :  { %358 = dma.vmem_to_hbm [thread:$0]  %s356_s11, 32, %s433_s1, [#allocation4]  }
  0xe8   :  { %411 = dma.done.wait [#allocation4], 32  }
  0xe9   :  { %412 = vsyncadd [#allocation4], 4294967264 }
  0xea   :  { %362 = vsyncpa [#allocation3], 1 }
  0xeb   :  { %363 = vsyncpa [#allocation4], 1 }

</bundles_post_ra>
